<compile_context>
chip_gen: v5e
topology: v5e:2x2
jax: 0.10.0
libtpu: 0.0.40
codegen_flags: <defaults>
</compile_context>

<pallas_src>
import functools

import jax
import jax.numpy as jnp
from jax import lax
from jax.experimental import pallas as pl
from jax.experimental.pallas import tpu as pltpu


# ---------------------------------------------------------------------------
# Kernels
# ---------------------------------------------------------------------------
def _se_single_block_kernel(x_ref, w1_ref, w2_ref, o_ref, *, inv_hw):
    """One (Bt, C, HW) NCHW block per grid step: pool + excite + scale fused."""
    # Squeeze: mean over the spatial (lane) axis, f32 accumulation.
    pooled = jnp.sum(x_ref[...], axis=2, dtype=jnp.float32) * inv_hw          # (Bt, C)

    # Excitation: pooled @ w1.T -> ReLU -> @ w2.T -> sigmoid (all f32).
    h = lax.dot_general(pooled, w1_ref[...], (((1,), (1,)), ((), ())),
                        preferred_element_type=jnp.float32)                   # (Bt, Cr)
    h = jnp.maximum(h, 0.0)
    logits = lax.dot_general(h, w2_ref[...], (((1,), (1,)), ((), ())),
                             preferred_element_type=jnp.float32)              # (Bt, C)
    gate = pl.reciprocal(1.0 + jnp.exp(-logits), approx=True)                 # sigmoid (EUP)

    # Scale: broadcast per-channel gate along the lane (HW) axis.
    gate = gate[:, :, None].astype(x_ref.dtype)                               # (Bt, C, 1)
    o_ref[...] = (x_ref[...] * gate).astype(o_ref.dtype)


def _se_pool_gate_kernel(x_ref, w1_ref, w2_ref, gate_ref, *,
                         inv_hw, hw_total, mask_tail):
    """Pass 1 of the two-pass path: accumulate pooled sums over HW tiles into the
    resident (Bt, C, 1) output block; compute the gate in the finalize step."""
    k = pl.program_id(1)

    @pl.when(k == 0)
    def _init():
        gate_ref[...] = jnp.zeros_like(gate_ref)

    x = x_ref[...]
    if mask_tail:
        # Last HW tile is padded; OOB lanes hold garbage -> mask before summing.
        hw_t = x.shape[2]
        col = lax.broadcasted_iota(jnp.int32, x.shape, 2) + k * hw_t
        x = jnp.where(col < hw_total, x, jnp.zeros_like(x))
    gate_ref[...] += jnp.sum(x, axis=2, keepdims=True, dtype=jnp.float32)

    @pl.when(k == pl.num_programs(1) - 1)
    def _finalize():
        pooled = gate_ref[...][:, :, 0] * inv_hw                              # (Bt, C)
        h = lax.dot_general(pooled, w1_ref[...], (((1,), (1,)), ((), ())),
                            preferred_element_type=jnp.float32)
        h = jnp.maximum(h, 0.0)
        logits = lax.dot_general(h, w2_ref[...], (((1,), (1,)), ((), ())),
                                 preferred_element_type=jnp.float32)
        gate_ref[...] = pl.reciprocal(1.0 + jnp.exp(-logits),
                                      approx=True)[:, :, None]


def _se_scale_kernel(x_ref, gate_ref, o_ref):
    """Pass 2 of the two-pass path: out = x * gate, streamed in (Bt, C, HWt) tiles."""
    gate = gate_ref[...].astype(x_ref.dtype)                                  # (Bt, C, 1)
    o_ref[...] = (x_ref[...] * gate).astype(o_ref.dtype)


# ---------------------------------------------------------------------------
# Tiling / VMEM heuristics (generation-aware)
# ---------------------------------------------------------------------------
def _vmem_budget(weight_bytes):
    """(vmem_limit_bytes, per-block byte budget) derived from physical VMEM."""
    try:
        cap = int(pltpu.get_tpu_info().vmem_capacity_bytes)
    except Exception:
        cap = 64 << 20                      # v7x per-core size: safe everywhere
    cap = max(min(cap, 256 << 20), 32 << 20)
    # ~75% of physical, always leaving >= 8 MiB for Mosaic internal scratch.
    vmem_limit = max(min((cap * 3) // 4, cap - (8 << 20)), 16 << 20)
    # in + out blocks double-buffered (4x) plus double-buffered weights + slack.
    block_budget = max((vmem_limit - 2 * weight_bytes - (2 << 20)) // 4, 1 << 20)
    return int(vmem_limit), int(block_budget)


def _pick_b_tile(B, row_bytes, budget_bytes, min_steps=4):
    """Largest divisor of B whose block fits `budget_bytes` while keeping the grid
    >= min(min_steps, B) steps (pipeline overlap + v7x megacore). 0 => no fit."""
    if row_bytes > budget_bytes:
        return 0
    cap = min(B,
              max(budget_bytes // row_bytes, 1),
              max(B // min(min_steps, B), 1))
    bt = int(cap)
    while B % bt:
        bt -= 1
    return max(bt, 1)


def _pick_hw_tile(C, HW, itemsize, budget_bytes, bt=1):
    """Lane-aligned (multiple of 128) HW tile for the two-pass path."""
    lanes = max((budget_bytes // max(bt * C * itemsize, 1)) // 128, 1) * 128
    return int(min(lanes, pl.cdiv(HW, 128) * 128))


# ---------------------------------------------------------------------------
# Wrapper
# ---------------------------------------------------------------------------
def se_layer(x, w1, w2, *, b_tile=None, hw_tile=None):
    """SELayer forward.  x: (B, C, H, W) NCHW.
    w1: (C//r, C), w2: (C, C//r)  (PyTorch Linear weight shapes, bias=False)."""
    B, C, H, W = x.shape
    HW = H * W
    Cr = w1.shape[0]
    assert w1.shape == (Cr, C) and w2.shape == (C, Cr)

    # Keep NCHW: merging the contiguous minor dims (H, W) -> HW is a free
    # (bitcast) reshape, so no extra HBM relayout pass is paid.
    x3 = x.reshape(B, C, HW)
    itemsize = x.dtype.itemsize
    weight_bytes = w1.size * w1.dtype.itemsize + w2.size * w2.dtype.itemsize
    vmem_limit, block_budget = _vmem_budget(weight_bytes)
    inv_hw = 1.0 / HW

    # ---------------- single-pass path: whole (Bt, C, HW) block fits ----------------
    if hw_tile is None:
        bt = b_tile if b_tile is not None else _pick_b_tile(B, C * HW * itemsize,
                                                            block_budget)
        if bt >= 1:
            out3 = pl.pallas_call(
                functools.partial(_se_single_block_kernel, inv_hw=inv_hw),
                out_shape=jax.ShapeDtypeStruct((B, C, HW), x.dtype),
                grid_spec=pltpu.PrefetchScalarGridSpec(
                    num_scalar_prefetch=0,
                    grid=(pl.cdiv(B, bt),),
                    in_specs=[
                        pl.BlockSpec((bt, C, HW), lambda b: (b, 0, 0)),
                        pl.BlockSpec((Cr, C), lambda b: (0, 0)),
                        pl.BlockSpec((C, Cr), lambda b: (0, 0)),
                    ],
                    out_specs=pl.BlockSpec((bt, C, HW), lambda b: (b, 0, 0)),
                ),
                compiler_params=pltpu.CompilerParams(
                    dimension_semantics=("parallel",),
                    vmem_limit_bytes=vmem_limit,
                ),
            )(x3, w1, w2)
            return out3.reshape(B, C, H, W)
        hw_tile = _pick_hw_tile(C, HW, itemsize, block_budget)

    # ---------------- two-pass path: HW-tiled (pool+gate, then scale) ----------------
    bt = b_tile if b_tile is not None else max(
        _pick_b_tile(B, C * hw_tile * itemsize, block_budget), 1)
    grid = (pl.cdiv(B, bt), pl.cdiv(HW, hw_tile))

    gate = pl.pallas_call(
        functools.partial(_se_pool_gate_kernel, inv_hw=inv_hw, hw_total=HW,
                          mask_tail=(HW % hw_tile != 0)),
        out_shape=jax.ShapeDtypeStruct((B, C, 1), jnp.float32),
        grid_spec=pltpu.PrefetchScalarGridSpec(
            num_scalar_prefetch=0,
            grid=grid,
            in_specs=[
                pl.BlockSpec((bt, C, hw_tile), lambda b, k: (b, 0, k)),
                pl.BlockSpec((Cr, C), lambda b, k: (0, 0)),
                pl.BlockSpec((C, Cr), lambda b, k: (0, 0)),
            ],
            out_specs=pl.BlockSpec((bt, C, 1), lambda b, k: (b, 0, 0)),
        ),
        compiler_params=pltpu.CompilerParams(
            dimension_semantics=("parallel", "arbitrary"),
            vmem_limit_bytes=vmem_limit,
        ),
    )(x3, w1, w2)

    out3 = pl.pallas_call(
        _se_scale_kernel,
        out_shape=jax.ShapeDtypeStruct((B, C, HW), x.dtype),
        grid_spec=pltpu.PrefetchScalarGridSpec(
            num_scalar_prefetch=0,
            grid=grid,
            in_specs=[
                pl.BlockSpec((bt, C, hw_tile), lambda b, k: (b, 0, k)),
                pl.BlockSpec((bt, C, 1), lambda b, k: (b, 0, 0)),
            ],
            out_specs=pl.BlockSpec((bt, C, hw_tile), lambda b, k: (b, 0, k)),
        ),
        compiler_params=pltpu.CompilerParams(
            dimension_semantics=("parallel", "parallel"),
            vmem_limit_bytes=vmem_limit,
        ),
    )(x3, gate)
    return out3.reshape(B, C, H, W)


def se_layer_ref(x, w1, w2):
    """Pure-JAX reference matching the PyTorch module."""
    y = jnp.mean(x, axis=(2, 3))                 # (B, C)
    y = jnp.maximum(y @ w1.T, 0.0)               # (B, Cr)
    y = jax.nn.sigmoid(y @ w2.T)                 # (B, C)
    return x * y[:, :, None, None]


if __name__ == "__main__":
    # Module config: channel=64, reduction=16 -> hidden = 4; H*W = 192 (ragged
    # vs. the 128-lane tile so the two-pass mask is exercised).
    B, C, H, W = 2, 64, 16, 12
    reduction = 16
    Cr = C // reduction

    key = jax.random.PRNGKey(0)
    kx, k1, k2 = jax.random.split(key, 3)

    x = jax.random.normal(kx, (B, C, H, W), dtype=jnp.float32)
    # PyTorch Linear weight shapes: (out_features, in_features)
    w1 = jax.random.normal(k1, (Cr, C), dtype=jnp.float32) * (1.0 / jnp.sqrt(C))
    w2 = jax.random.normal(k2, (C, Cr), dtype=jnp.float32) * (1.0 / jnp.sqrt(Cr))

    ref = jax.block_until_ready(se_layer_ref(x, w1, w2))

    # Fused single-block path (auto tiling).
    out = jax.block_until_ready(se_layer(x, w1, w2))
    assert out.shape == (B, C, H, W)
    # rtol absorbs the EUP approximate reciprocal in the sigmoid gate.
    assert jnp.allclose(out, ref, atol=1e-4, rtol=5e-3), "single-pass mismatch"

    # Two-pass HW-tiled path (forced small hw_tile to exercise it at test shapes).
    out2 = jax.block_until_ready(se_layer(x, w1, w2, hw_tile=128))
    assert jnp.allclose(out2, ref, atol=1e-4, rtol=5e-3), "two-pass mismatch"

    print("KERNEL_OK")
</pallas_src>

<mosaic_0001>
module attributes {stable_mosaic.version = 11 : i64} {
  func.func @_se_single_block_kernel(%arg0: i32, %arg1: memref<1x64x192xf32, #tpu.memory_space<vmem>>, %arg2: memref<4x64xf32, #tpu.memory_space<vmem>>, %arg3: memref<64x4xf32, #tpu.memory_space<vmem>>, %arg4: memref<1x64x192xf32, #tpu.memory_space<vmem>>) attributes {dimension_semantics = [#tpu.dimension_semantics<parallel>], iteration_bounds = array<i64: 2>, scalar_prefetch = 0 : i64, scratch_operands = 0 : i64, tpu.core_type = #tpu.core_type<tc>, window_params = [{transform_indices = @transform_0, window_bounds = array<i64: 1, 64, 192>}, {pipeline_mode = #tpu.pipeline_mode<synchronous>, transform_indices = @transform_1, window_bounds = array<i64: 4, 64>}, {pipeline_mode = #tpu.pipeline_mode<synchronous>, transform_indices = @transform_2, window_bounds = array<i64: 64, 4>}, {transform_indices = @transform_3, window_bounds = array<i64: 1, 64, 192>}]} {
    %c0 = arith.constant 0 : index
    %c0_0 = arith.constant 0 : index
    %c0_1 = arith.constant 0 : index
    %0 = vector.load %arg1[%c0, %c0_0, %c0_1] : memref<1x64x192xf32, #tpu.memory_space<vmem>>, vector<1x64x192xf32>
    %cst = arith.constant dense<0.000000e+00> : vector<1x64xf32>
    %1 = vector.multi_reduction <add>, %0, %cst [2] : vector<1x64x192xf32> to vector<1x64xf32>
    %cst_2 = arith.constant 0.00520833349 : f32
    %2 = vector.broadcast %cst_2 : f32 to vector<1x64xf32>
    %3 = arith.mulf %1, %2 : vector<1x64xf32>
    %c0_3 = arith.constant 0 : index
    %c0_4 = arith.constant 0 : index
    %4 = vector.load %arg2[%c0_3, %c0_4] : memref<4x64xf32, #tpu.memory_space<vmem>>, vector<4x64xf32>
    %cst_5 = arith.constant dense<0.000000e+00> : vector<1x4xf32>
    %5 = tpu.matmul %3, %4, %cst_5 {dimension_numbers = #tpu.dot_dimension_numbers<[1], [1], [0], [0], [0, 0, 1, 0], [], []>} : vector<1x64xf32>, vector<4x64xf32>, vector<1x4xf32> -> vector<1x4xf32>
    %cst_6 = arith.constant 0.000000e+00 : f32
    %6 = vector.broadcast %cst_6 : f32 to vector<1x4xf32>
    %7 = arith.maximumf %5, %6 : vector<1x4xf32>
    %c0_7 = arith.constant 0 : index
    %c0_8 = arith.constant 0 : index
    %8 = vector.load %arg3[%c0_7, %c0_8] : memref<64x4xf32, #tpu.memory_space<vmem>>, vector<64x4xf32>
    %cst_9 = arith.constant dense<0.000000e+00> : vector<1x64xf32>
    %9 = tpu.matmul %7, %8, %cst_9 {dimension_numbers = #tpu.dot_dimension_numbers<[1], [1], [0], [0], [0, 0, 1, 0], [], []>} : vector<1x4xf32>, vector<64x4xf32>, vector<1x64xf32> -> vector<1x64xf32>
    %cst_10 = arith.constant 0.000000e+00 : f32
    %10 = vector.broadcast %cst_10 : f32 to vector<1x64xf32>
    %11 = arith.subf %10, %9 : vector<1x64xf32>
    %12 = math.exp %11 : vector<1x64xf32>
    %cst_11 = arith.constant 1.000000e+00 : f32
    %13 = vector.broadcast %cst_11 : f32 to vector<1x64xf32>
    %14 = arith.addf %13, %12 : vector<1x64xf32>
    %15 = tpu.reciprocal %14 {approx = true} : vector<1x64xf32> -> vector<1x64xf32>
    %16 = vector.shape_cast %15 : vector<1x64xf32> to vector<1x64x1xf32>
    %c0_12 = arith.constant 0 : index
    %c0_13 = arith.constant 0 : index
    %c0_14 = arith.constant 0 : index
    %17 = vector.load %arg1[%c0_12, %c0_13, %c0_14] : memref<1x64x192xf32, #tpu.memory_space<vmem>>, vector<1x64x192xf32>
    %18 = vector.broadcast %16 : vector<1x64x1xf32> to vector<1x64x192xf32>
    %19 = arith.mulf %17, %18 : vector<1x64x192xf32>
    %c0_15 = arith.constant 0 : index
    %c0_16 = arith.constant 0 : index
    %c0_17 = arith.constant 0 : index
    %20 = vector.load %arg4[%c0_15, %c0_16, %c0_17] : memref<1x64x192xf32, #tpu.memory_space<vmem>>, vector<1x64x192xf32>
    tpu.vector_store %arg4[%c0_15, %c0_16, %c0_17], %19 {strides = array<i32>} : memref<1x64x192xf32, #tpu.memory_space<vmem>>, vector<1x64x192xf32>,
    return
  }
  func.func @transform_0(%arg0: i32) -> (i32, i32, i32) {
    %c0_i32 = arith.constant 0 : i32
    %c0_i32_0 = arith.constant 0 : i32
    %c0_i32_1 = arith.constant 0 : i32
    return %arg0, %c0_i32, %c0_i32_0 : i32, i32, i32
  }
  func.func @transform_1(%arg0: i32) -> (i32, i32) {
    %c0_i32 = arith.constant 0 : i32
    %c0_i32_0 = arith.constant 0 : i32
    %c0_i32_1 = arith.constant 0 : i32
    return %c0_i32, %c0_i32_0 : i32, i32
  }
  func.func @transform_2(%arg0: i32) -> (i32, i32) {
    %c0_i32 = arith.constant 0 : i32
    %c0_i32_0 = arith.constant 0 : i32
    %c0_i32_1 = arith.constant 0 : i32
    return %c0_i32, %c0_i32_0 : i32, i32
  }
  func.func @transform_3(%arg0: i32) -> (i32, i32, i32) {
    %c0_i32 = arith.constant 0 : i32
    %c0_i32_0 = arith.constant 0 : i32
    %c0_i32_1 = arith.constant 0 : i32
    return %arg0, %c0_i32, %c0_i32_0 : i32, i32, i32
  }
}

</mosaic_0001>

<bundles_post_ra>
// kernel: tpu_custom_call.1
= control target key start
LH: loop header
LB: loop body
LE: loop exit
PB: predicated region body
PF: predicated region fallthrough
CT: control target
= control target key end

     0   :  { %8 = vsyncpa [#allocation3], 0  ;;  %s1043_s0 = inlined_call_operand.hbm [shape: f32[2,64,192], index: 0, kind: input, shape index: {}]   ;;  %s1044_s1 = inlined_call_operand.vmem [shape: f32[4,64], index: 1, kind: input, shape index: {}]   ;;  %s1045_s2 = inlined_call_operand.vmem [shape: f32[64,4], index: 2, kind: input, shape index: {}]   ;;  %s1046_s3 = inlined_call_operand.hbm [shape: f32[2,64,192], index: 3, kind: output, shape index: {}]  }
   0x1   :  { %10 = vsyncpa [#allocation3 + $0x1], 0 }
   0x2   :  { %11 = vsyncpa [#allocation4], 0 }
   0x3   :  { %13 = vsyncpa [#allocation4 + $0x1], 0  ;;  %s757_s12 = smov 0   ;;  %s759_s13 = smov 0  }
   0x4   :  { %s761_s14 = smov 0   ;;  %s763_s15 = smov 0  }
   0x5 LB: > { %s778_s16 = sadd.s32 4294967295, %s731_s15   ;;  %s545_s17 = sadd.s32 4294967294, %s731_s15   ;;  %s731_s15 = sphi %s763_s15, %s1056_s15   ;;  %s727_s14 = sphi %s761_s14, %s1055_s14   ;;  %s723_s13 = sphi %s759_s13, %s1054_s13   ;;  %s719_s12 = sphi %s757_s12, %s1053_s12  }
   0x6   : > { %s782_s18 = sadd.s32 1, %s731_s15   ;;  %s26_s19 = sadd.s32 1, %s727_s14 }
   0x7   : > { %s23_s20 = ssub.s32 %s731_s15, %s782_s18  ;;  %p33_p0 = scmp.ne.s32.totalorder %s727_s14, %s723_s13 }
   0x8   : > { %p24_p1 = scmp.eq.s32.totalorder %s23_s20, 0  ;;  %p34_p2 = scmp.eq.s32.totalorder %s731_s15, 0 }
   0x9   : > { %p39_p3 = scmp.ne.s32.totalorder %s723_s13, %s719_s12  ;;  %p40_p4 = scmp.eq.s32.totalorder %s778_s16, 0 }
   0xa   : > { %s794_s21 = scalar_select %p24_p1, %s727_s14, %s26_s19  }
   0xb   : > { %p796_p5 = por %p34_p2, %p33_p0  ;;  %p800_p6 = por %p40_p4, %p39_p3 }
   0xc   : > { %p105_p7 = scmp.eq.s32.totalorder %s778_s16, 1  ;;  %p111_p8 = scmp.eq.s32.totalorder %s545_s17, 1 }
   0xd   : > { %p584_p10 = scmp.lt.s32.totalorder %s731_s15, 2  ;;  %s137_s26 = sand.u32 1, %s727_s14  }
   0xe   : > { %p807_p11 = por %p105_p7, %p33_p0  ;;  %p811_p12 = por %p111_p8, %p39_p3 }
   0xf   : > { %s570_s27 = sshll.u32 %s731_s15, 7  ;;  %s548_s28 = sshll.u32 %s137_s26, 7 }
  0x10   : > { %s146_s4 = scalar_lea.hbm %s1043_s0, %s570_s27  ;;  %s141_s6 = scalar_lea.vmem [#allocation2], %s548_s28 }
  0x11   : > { %s147_s5 = sshll.u32 %s146_s4, 4  ;;  %s149_s7 = sshll.u32 %s141_s6, 4  ;;  %s148_s5 = int_to_ptr.hbm [resolvable:$true] %s147_s5  ;;  %s150_s7 = int_to_ptr.vmem [resolvable:$true] %s149_s7 }
  0x12   : > { %p822_p13 = pnand %p584_p10, %p796_p5  ;;  %p551_p0 = scmp.ge.s32.totalorder %s731_s15, 1 }
  0x13   : > { %p157_p1 = scmp.lt.s32.totalorder %s731_s15, 3  ;;  %s138_s9 = scalar_lea.sflag [#allocation3], %s137_s26 }
  0x14   : > { %s635_s10 = sshra.s32 %s148_s5, 4  ;;  %p639_p3 = pneg %p822_p13  ;;  %s636_s10 = int_to_ptr.hbm [resolvable:$true] %s635_s10 }
  0x15   : > { %s637_s11 = scalar_lea.hbm %s636_s10, 128  ;;  %s642_s20 = scalar_lea.hbm %s1043_s0, 256 }
  0x16   : > { %p638_p2 = scmp.ne.s32.totalorder %s636_s10, %s637_s11  ;;  %p643_p5 = scmp.lt.s32.totalorder %s636_s10, %s1043_s0 }
  0x17   : > { %p644_p8 = scmp.lt.s32.totalorder %s642_s20, %s637_s11 }
  0x18   : > { %p640_p4 = pnand %p639_p3, %p638_p2 }
  0x19   : > { %p645_p10 = por %p644_p8, %p643_p5 }
  0x1a   : > { %p641_p7 = pneg %p640_p4 }
  0x1c   : > { %p646_p9 = pnand %p645_p10, %p641_p7 }
  0x1e   : > { %649 = shalt.err (!%p646_p9)
}
  0x1f   : > { %s733_s26 = smov 256   ;;  %s734_s28 = smov 16  }
  0x20   : > { %579 = dma.hbm_to_vmem [thread:$0]  (!%p822_p13), %s148_s5, 2048, %s150_s7, %s138_s9, %s733_s26, %s733_s26, %s734_s28  }
  0x21   : > { %p158_p2 = pnand %p551_p0, %p157_p1 }
  0x22   : > { %s843_s29 = sand.u32 (!%p158_p2), 1, %s723_s13  }
  0x23   : > { %161 = sbr.rel (%p158_p2) target bundleno = 613 (0x265), region = 32  ;;  %s552_s30 = sshll.u32 (!%p158_p2), %s843_s29, 7 }
  0x24   : > { %s164_s4 = scalar_lea.sflag (!%p158_p2), [#allocation3], %s843_s29  ;;  %s849_s6 = scalar_lea.vmem (!%p158_p2), [#allocation2], %s552_s30 }
  0x28   : > { %710 = dma.done.wait (%p800_p6), %s164_s4, 2048  }
  0x29   : > { %712 = vsyncadd (%p800_p6), %s164_s4, 4294965248  ;;  %vm207_vm0 = vcmask 523264   ;;  %v856_v0 = vld [vmem:[%s849_s6] sm:$0xff]  ;;  %v859_v1 = vld [vmem:[%s849_s6 + $0x8] sm:$0xff]  ;;  %vm322_vm1 = vcmask 31744   ;;  %v257_v36 = vlaneseq  ;;  %vm262_vm2 = vcmask 130112  }
  0x2a   : > { %v862_v2 = vld [vmem:[%s849_s6 + $0x20] sm:$0xff]  ;;  %v208_v3 = vsel %vm207_vm0, %v859_v1, 0.0  ;;  %v867_v4 = vld [vmem:[%s849_s6 + $0x28] sm:$0xff]  ;;  %v881_v10 = vld [vmem:[%s849_s6 + $0x18] sm:$0xff]  ;;  %vm266_vm3 = vcmask 195712   ;;  %vm270_vm4 = vcmask 261312  }
  0x2b   : > { %v870_v5 = vld [vmem:[%s849_s6 + $0x40] sm:$0xff]  ;;  %v873_v6 = vld [vmem:[%s849_s6 + $0x48] sm:$0xff]  ;;  %v209_v7 = vadd.f32 %v208_v3, %v856_v0  ;;  %v216_v8 = vsel %vm207_vm0, %v867_v4, 0.0  ;;  %v886_v13 = vld [vmem:[%s849_s6 + $0x38] sm:$0xff]  ;;  %v212_v16 = vsel %vm207_vm0, %v881_v10, 0.0  ;;  %v258_v41 = vand.u32 127, %v257_v36 }
  0x2c   : > { %v224_v9 = vsel %vm207_vm0, %v873_v6, 0.0  ;;  %v217_v11 = vadd.f32 %v216_v8, %v862_v2  ;;  %v889_v14 = vld [vmem:[%s849_s6 + $0x58] sm:$0xff]  ;;  %v892_v15 = vld [vmem:[%s849_s6 + $0x10] sm:$0xff]  ;;  %v220_v18 = vsel %vm207_vm0, %v886_v13, 0.0  ;;  %v910_v24 = vld [vmem:[%s849_s6 + $0x68] sm:$0xff]  ;;  %vm274_vm5 = vcmask 326912  }
  0x2d   : > { %v225_v12 = vadd.f32 %v224_v9, %v870_v5  ;;  %210 = vadd.xlane.f32.xlu0 %v209_v7  ;;  %v897_v17 = vld [vmem:[%s849_s6 + $0x30] sm:$0xff]  ;;  %v228_v20 = vsel %vm207_vm0, %v889_v14, 0.0  ;;  %v213_v21 = vadd.f32 %v212_v16, %v892_v15  ;;  %v913_v25 = vld [vmem:[%s849_s6 + $0x78] sm:$0xff]  ;;  %v916_v26 = vld [vmem:[%s849_s6 + $0x60] sm:$0xff]  ;;  %v232_v27 = vsel %vm207_vm0, %v910_v24, 0.0  ;;  %s969_s7 = scalar_lea.vmem [#allocation5], %s552_s30 }
  0x2e   : > { %218 = vadd.xlane.f32.xlu1 %v217_v11  ;;  %v902_v19 = vld [vmem:[%s849_s6 + $0x50] sm:$0xff]  ;;  %v221_v22 = vadd.f32 %v220_v18, %v897_v17  ;;  %v236_v29 = vsel %vm207_vm0, %v913_v25, 0.0  ;;  %v233_v30 = vadd.f32 %v232_v27, %v916_v26  ;;  %v248_v32 = vld [vmem:[%s1044_s1] sm:$0xf]  ;;  %v321_v33 = vld [vmem:[%s1045_s2 + $0x38] sm:$0xff]  ;;  %v260_v44 = vadd.s32 4294967288, %v258_v41 }
  0x2f   : > { %226 = vadd.xlane.f32.xlu2 %v225_v12  ;;  %v229_v23 = vadd.f32 %v228_v20, %v902_v19  ;;  %v921_v28 = vld [vmem:[%s849_s6 + $0x70] sm:$0xff]  ;;  %554 = vmatpush.xpose.msk.msra.mxu0 %vm207_vm0, %v248_v32  ;;  %v319_v35 = vld [vmem:[%s1045_s2 + $0x28] sm:$0xff]  ;;  %v318_v40 = vld [vmem:[%s1045_s2 + $0x20] sm:$0xff]  ;;  %v264_v45 = vadd.s32 4294967280, %v258_v41  ;;  %v268_v48 = vadd.s32 4294967272, %v258_v41  ;;  %v272_v53 = vadd.s32 4294967264, %v258_v41 }
  0x30   : > { %v237_v31 = vadd.f32 %v236_v29, %v921_v28  ;;  %556 = vmatpush.xpose.msk.msra.mxu1 %vm322_vm1, %v321_v33  ;;  %v320_v34 = vld [vmem:[%s1045_s2 + $0x30] sm:$0xff]  ;;  %v317_v42 = vld [vmem:[%s1045_s2 + $0x18] sm:$0xff]  ;;  %v276_v60 = vadd.s32 4294967256, %v258_v41  ;;  %v315_v63 = vld [vmem:[%s1045_s2 + $0x8] sm:$0xff]  ;;  %v280_v9 = vadd.s32 4294967248, %v258_v41  ;;  %v284_v16 = vadd.s32 4294967240, %v258_v41 }
  0x31   : > { %v316_v52 = vld [vmem:[%s1045_s2 + $0x10] sm:$0xff]  ;;  %vm278_vm6 = vcmask 392512   ;;  %vm282_vm7 = vcmask 458112   ;;  %vm286_vm8 = vcmask 523712   ;;  %v314_v32 = vld [vmem:[%s1045_s2] sm:$0xff]  ;;  %s571_s30 = sshll.u32 %s778_s16, 7 }
  0x32   : > { %s468_s10 = scalar_lea.hbm %s1046_s3, %s571_s30  ;;  %s469_s11 = sshll.u32 %s969_s7, 4  ;;  %s470_s11 = int_to_ptr.vmem [resolvable:$true] %s469_s11 }
  0x33   : > { %s471_s17 = sshll.u32 %s468_s10, 4  ;;  %s457_s16 = scalar_lea.sflag [#allocation4], %s843_s29  ;;  %s472_s17 = int_to_ptr.hbm [resolvable:$true] %s471_s17 }
  0x34   : > { %557 = vmatpush.xpose.msk.msra.mxu1 %vm322_vm1, %v320_v34  ;;  %s679_s19 = sshra.s32 %s472_s17, 4  ;;  %s685_s26 = scalar_lea.hbm %s1046_s3, 256  ;;  %s680_s19 = int_to_ptr.hbm [resolvable:$true] %s679_s19 }
  0x35   : > { %214 = vadd.xlane.f32.xlu0 %v213_v21  ;;  %s681_s20 = scalar_lea.hbm %s680_s19, 128  ;;  %p686_p0 = scmp.lt.s32.totalorder %s680_s19, %s1046_s3 }
  0x36   : > { %222 = vadd.xlane.f32.xlu1 %v221_v22  ;;  %p682_p6 = scmp.ne.s32.totalorder %s680_s19, %s681_s20  ;;  %p687_p1 = scmp.lt.s32.totalorder %s685_s26, %s681_s20 }
  0x37   : > { %230 = vadd.xlane.f32.xlu2 %v229_v23 }
  0x38   : > { %558 = vmatpush.xpose.msk.msra.mxu1 %vm322_vm1, %v319_v35  ;;  %v377_v35 = vshrl.u32 %v257_v36, 7  ;;  %p683_p9 = pnand %p682_p6, %p807_p11  ;;  %p688_p3 = por %p687_p1, %p686_p0 }
  0x3a   : > { %622 = vset.pattern.permute.xlu2 %v377_v35  ;;  %v420_v36 = vadd.s32 56, %v377_v35  ;;  %p684_p13 = pneg %p683_p9 }
  0x3c   : > { %559 = vmatpush.xpose.msk.msra.mxu1 %vm322_vm1, %v318_v40  ;;  %p689_p4 = pnand %p688_p3, %p684_p13 }
  0x3d   : > { %234 = vadd.xlane.f32.xlu0 %v233_v30 }
  0x3e   : > { %238 = vadd.xlane.f32.xlu1 %v237_v31 }
  0x40   : > { %560 = vmatpush.xpose.msk.msra.mxu1 %vm322_vm1, %v317_v42 }
  0x44   : > { %561 = vmatpush.xpose.msk.msra.mxu1 %vm322_vm1, %v316_v52 }
  0x48   : > { %562 = vmatpush.xpose.msk.msra.mxu1 %vm322_vm1, %v315_v63 }
  0x4c   : > { %563 = vmatpush.xpose.msk.msra.mxu1 %vm322_vm1, %v314_v32 }
  0xa0   : > { %v211_v37 = vpop.xlane.xlu0 %210 }
  0xa1   : > { %v219_v38 = vpop.xlane.xlu1 %218  ;;  %v240_v43 = vmul.f32 0.0052083335, %v211_v37  ;;  %v390_v37 = vadd.s32 16, %v377_v35 }
  0xa2   : > { %v227_v39 = vpop.xlane.xlu2 %226  ;;  %v242_v46 = vmul.f32 0.0052083335, %v219_v38  ;;  %v384_v38 = vadd.s32 8, %v377_v35 }
  0xa3   : > { %v259_v55 = vperm.slane %v240_v43, %v258_v41  ;;  %v244_v56 = vmul.f32 0.0052083335, %v227_v39  ;;  %624 = vset.pattern.permute.xlu1 %v390_v37 }
  0xa4   : > { %v265_v58 = vperm.slane %v242_v46, %v264_v45  ;;  %623 = vset.pattern.permute.xlu0 %v384_v38  ;;  %v408_v46 = vadd.s32 40, %v377_v35 }
  0xa5   : > { %v273_v7 = vperm.slane %v244_v56, %v272_v53 }
  0xa8   : > { %v215_v47 = vpop.xlane.xlu0 %214 }
  0xa9   : > { %v241_v49 = vmul.f32 0.0052083335, %v215_v47  ;;  %v223_v50 = vpop.xlane.xlu1 %222  ;;  %v396_v47 = vadd.s32 24, %v377_v35 }
  0xaa   : > { %v231_v51 = vpop.xlane.xlu2 %230  ;;  %v243_v54 = vmul.f32 0.0052083335, %v223_v50 }
  0xab   : > { %v261_v57 = vperm.slane %v241_v49, %v260_v44  ;;  %v245_v61 = vmul.f32 0.0052083335, %v231_v51  ;;  %v414_v49 = vadd.s32 48, %v377_v35 }
  0xac   : > { %v269_v59 = vperm.slane %v243_v54, %v268_v48  ;;  %v402_v48 = vadd.s32 32, %v377_v35 }
  0xad   : > { %v263_v62 = vsel %vm262_vm2, %v261_v57, %v259_v55  ;;  %v277_v11 = vperm.slane %v245_v61, %v276_v60 }
  0xae   : > { %v267_v3 = vsel %vm266_vm3, %v265_v58, %v263_v62 }
  0xaf   : > { %v271_v8 = vsel %vm270_vm4, %v269_v59, %v267_v3 }
  0xb0   : > { %v235_v12 = vpop.xlane.xlu0 %234  ;;  %v275_v21 = vsel %vm274_vm5, %v273_v7, %v271_v8 }
  0xb1   : > { %v246_v18 = vmul.f32 0.0052083335, %v235_v12  ;;  %v239_v20 = vpop.xlane.xlu1 %238  ;;  %v279_v29 = vsel %vm278_vm6, %v277_v11, %v275_v21 }
  0xb2   : > { %v247_v22 = vmul.f32 0.0052083335, %v239_v20 }
  0xb3   : > { %v281_v23 = vperm.slane %v246_v18, %v280_v9 }
  0xb4   : > { %v285_v27 = vperm.slane %v247_v22, %v284_v16 }
  0xb5   : > { %v283_v30 = vsel %vm282_vm7, %v281_v23, %v279_v29 }
  0xb6   : > { %v287_v31 = vsel %vm286_vm8, %v285_v27, %v283_v30 }
  0xb7   : > { %555 = vmatmul.msk.f32.vlgmr.msra.gmra.mxu0 %vm207_vm0, %v287_v31 }
 0x134   : > { %v310_v33 = vpop.f32.mrf.mxu0 }
 0x135   : > { %v313_v34 = vmax.f32 %v310_v33, 0.0 }
 0x137   : > { %564 = vmatmul.msk.f32.vlgmr.msra.gmra.mxu1 %vm322_vm1, %v313_v34 }
 0x1b4   : > { %v367_v39 = vpop.f32.mrf.mxu1 }
 0x1b5   : > { %v370_v40 = vsub.f32 0.0, %v367_v39 }
 0x1b7   : > { %v371_v41 = vmul.f32 1.442695, %v370_v40 }
 0x1b9   : > { %631 = vpow2.f32 %v371_v41 }
 0x1bf   : > { %v632_v42 = vpop.eup %631 }
 0x1c0   : > { %v373_v43 = vadd.f32 1.0, %v632_v42 }
 0x1c2   : > { %633 = vrcp.f32 %v373_v43 }
 0x1c8   : > { %v634_v44 = vpop.eup %633 }
 0x1c9   : > { %v375_v45 = vperm.slane %v634_v44, 0 }
 0x1cb   : > { %392 = vperm.xlu1 %624, %v375_v45   ;;  %386 = vperm.xlu0 %623, %v375_v45  }
 0x1cc   : > { %380 = vperm.xlu2 %622, %v375_v45  }
 0x1d3   : > { %627 = vset.pattern.permute.xlu1 %v408_v46  ;;  %630 = vset.pattern.permute.xlu0 %v420_v36 }
 0x1d4   : > { %625 = vset.pattern.permute.xlu2 %v396_v47 }
 0x1db   : > { %410 = vperm.xlu1 %627, %v375_v45  }
 0x1dc   : > { %398 = vperm.xlu2 %625, %v375_v45  }
 0x1e3   : > { %629 = vset.pattern.permute.xlu1 %v420_v36 }
 0x1e4   : > { %626 = vset.pattern.permute.xlu2 %v402_v48 }
 0x1eb   : > { %422 = vperm.xlu1 %629, %v375_v45  }
 0x1ec   : > { %404 = vperm.xlu2 %626, %v375_v45  }
 0x1f4   : > { %628 = vset.pattern.permute.xlu2 %v414_v49 }
 0x1fc   : > { %416 = vperm.xlu2 %628, %v375_v45  }
 0x226   : > { %v381_v50 = vpop.permute.xlu2 %380 }
 0x227   : > { %v424_v51 = vmul.f32 %v381_v50, %v856_v0  ;;  %v425_v52 = vmul.f32 %v381_v50, %v859_v1 }
 0x229   : > { %440 = vst [vmem:[%s969_s7] sm:$0xff] %v424_v51 }
 0x22a   : > { %441 = vst.msk [vmem:[%s969_s7 + $0x8] sm:$0xff] %vm207_vm0, %v425_v52 }
 0x236   : > { %v399_v53 = vpop.permute.xlu2 %398 }
 0x237   : > { %v430_v54 = vmul.f32 %v399_v53, %v897_v17  ;;  %v431_v0 = vmul.f32 %v399_v53, %v886_v13 }
 0x239   : > { %446 = vst [vmem:[%s969_s7 + $0x30] sm:$0xff] %v430_v54 }
 0x23a   : > { %447 = vst.msk [vmem:[%s969_s7 + $0x38] sm:$0xff] %vm207_vm0, %v431_v0 }
 0x23d   : > { %v393_v1 = vpop.permute.xlu1 %392  ;;  %v387_v55 = vpop.permute.xlu0 %386 }
 0x23e   : > { %v428_v56 = vmul.f32 %v393_v1, %v862_v2  ;;  %v429_v57 = vmul.f32 %v393_v1, %v867_v4  ;;  %v426_v58 = vmul.f32 %v387_v55, %v892_v15  ;;  %v427_v17 = vmul.f32 %v387_v55, %v881_v10 }
 0x240   : > { %444 = vst [vmem:[%s969_s7 + $0x20] sm:$0xff] %v428_v56 }
 0x241   : > { %445 = vst.msk [vmem:[%s969_s7 + $0x28] sm:$0xff] %vm207_vm0, %v429_v57 }
 0x242   : > { %442 = vst [vmem:[%s969_s7 + $0x10] sm:$0xff] %v426_v58 }
 0x243   : > { %443 = vst.msk [vmem:[%s969_s7 + $0x18] sm:$0xff] %vm207_vm0, %v427_v17 }
 0x246   : > { %v405_v13 = vpop.permute.xlu2 %404 }
 0x247   : > { %v432_v2 = vmul.f32 %v405_v13, %v870_v5  ;;  %v433_v4 = vmul.f32 %v405_v13, %v873_v6 }
 0x249   : > { %448 = vst [vmem:[%s969_s7 + $0x40] sm:$0xff] %v432_v2 }
 0x24a   : > { %449 = vst.msk [vmem:[%s969_s7 + $0x48] sm:$0xff] %vm207_vm0, %v433_v4 }
 0x24d   : > { %v411_v15 = vpop.permute.xlu1 %410 }
 0x24e   : > { %v434_v10 = vmul.f32 %v411_v15, %v902_v19  ;;  %v435_v59 = vmul.f32 %v411_v15, %v889_v14 }
 0x250   : > { %450 = vst [vmem:[%s969_s7 + $0x50] sm:$0xff] %v434_v10 }
 0x251   : > { %451 = vst.msk [vmem:[%s969_s7 + $0x58] sm:$0xff] %vm207_vm0, %v435_v59 }
 0x256   : > { %v417_v60 = vpop.permute.xlu2 %416 }
 0x257   : > { %v436_v5 = vmul.f32 %v417_v60, %v916_v26  ;;  %v437_v6 = vmul.f32 %v417_v60, %v910_v24 }
 0x259   : > { %452 = vst [vmem:[%s969_s7 + $0x60] sm:$0xff] %v436_v5 }
 0x25a   : > { %453 = vst.msk [vmem:[%s969_s7 + $0x68] sm:$0xff] %vm207_vm0, %v437_v6 }
 0x25d   : > { %v423_v14 = vpop.permute.xlu1 %422 }
 0x25e   : > { %v438_v19 = vmul.f32 %v423_v14, %v921_v28  ;;  %v439_v61 = vmul.f32 %v423_v14, %v913_v25 }
 0x260   : > { %454 = vst [vmem:[%s969_s7 + $0x70] sm:$0xff] %v438_v19 }
 0x261   : > { %455 = vst.msk [vmem:[%s969_s7 + $0x78] sm:$0xff] %vm207_vm0, %v439_v61 }
 0x262   : > { %692 = shalt.err (!%p689_p4)
}
 0x263   : > { %s735_s29 = smov 256   ;;  %s736_s6 = smov 16  }
 0x264   : > { %574 = dma.vmem_to_hbm [thread:$0]  (%p807_p11), %s470_s11, 2048, %s472_s17, %s457_s16, %s735_s29, %s735_s29, %s736_s6  }
 0x265 PF: > { %s486_s23 = sand.u32 1, %s719_s12   ;;  %p1052_p7 = scmp.ge.s32.totalorder %s731_s15, 2 }
 0x266   : > { %s487_s5 = scalar_lea.sflag [#allocation4], %s486_s23 }
 0x267   : > { %p581_p5 = pnand %p1052_p7, %p811_p12 }
 0x269   : > { %p582_p8 = pneg %p581_p5 }
 0x26b   : > { %714 = dma.done.wait (%p582_p8), %s487_s5, 2048  }
 0x26c   : > { %716 = vsyncadd (%p582_p8), %s487_s5, 4294965248  ;;  %p16_p10 = scmp.ge.s32.totalorder %s782_s18, 4   ;;  %s1053_s12 = smov %s723_s13 }
 0x26d   : > { %s1054_s13 = smov %s727_s14  ;;  %s1055_s14 = smov %s794_s21 }
 0x26e   : > { %s1056_s15 = smov %s782_s18  ;;  %18 = sbr.rel (!%p16_p10) target bundleno = 5 (0x5), region = 77 }
 0x273   :  { %493 = vsyncpa [#allocation3], 1 }
 0x274   :  { %495 = vsyncpa [#allocation3 + $0x1], 1 }
 0x275   :  { %496 = vsyncpa [#allocation4], 1 }
 0x276   :  { %498 = vsyncpa [#allocation4 + $0x1], 1 }

</bundles_post_ra>
